<compile_context>
chip_gen: v6e
topology: v6e:2x2x1
jax: 0.10.0
libtpu: 0.0.40
codegen_flags: <defaults>
</compile_context>

<pallas_src>
import math

import jax
import jax.numpy as jnp
from jax.experimental import pallas as pl
from jax.experimental.pallas import tpu as pltpu


def _round_up(x, m):
    return ((x + m - 1) // m) * m


def _linear_kernel(x_ref, w_ref, b_ref, o_ref):
    # x_ref: (TM, F)   w_ref: (F, OUTp)   b_ref: (1, OUTp)   o_ref: (TM, OUTp)
    acc = jnp.dot(x_ref[...], w_ref[...], preferred_element_type=jnp.float32)
    o_ref[...] = (acc + b_ref[...]).astype(o_ref.dtype)


def prepare_params(weight, bias):
    """One-time prep of the static nn.Linear params for the Pallas kernel.

    weight: (out_features, in_features) float32  (PyTorch nn.Linear layout)
    bias:   (out_features,)             float32
    Returns:
      w_t_pad: (in_features, out_pad) float32  -- transposed, OUT zero-padded to 128
      b_pad:   (1, out_pad)           float32  -- OUT zero-padded to 128
    Call this once at init / after each param update, NOT per forward.
    """
    out_features, in_features = weight.shape
    out_pad = _round_up(out_features, 128)
    w_t_pad = (jnp.zeros((in_features, out_pad), jnp.float32)
               .at[:, :out_features].set(weight.T.astype(jnp.float32)))
    b_pad = (jnp.zeros((1, out_pad), jnp.float32)
             .at[0, :out_features].set(bias.astype(jnp.float32)))
    return w_t_pad, b_pad


def dqn_network_forward(x, w_t_pad, b_pad, out_features):
    """Pallas equivalent of dqn_network.forward.

    x:        (n_mac * n_job,) float32         -> returns (1, n_mac)  [module semantics]
              or (B, n_mac * n_job) float32    -> returns (B, n_mac)  [batched fast path]
    w_t_pad:  (n_mac*n_job, out_pad) float32   (from prepare_params)
    b_pad:    (1, out_pad) float32             (from prepare_params)
    out_features: n_mac (unpadded output width)
    """
    if x.ndim == 1:
        x2d = x[None, :]                      # == X.unsqueeze(0)
    else:
        x2d = x
    batch, in_features = x2d.shape
    out_pad = w_t_pad.shape[1]

    x2d = x2d.astype(jnp.float32)

    # ---- batch tiling (only the activation ever gets padded, and only on M) ----
    if batch <= 128:
        # Single block; full-dim block dims are legal under the (8,128) rule,
        # so no padding at all.
        tm = batch
        b_total = batch
        x_p = x2d
    else:
        # tm=128: at most 127 wasted rows, and grid >= 2 lets the "parallel"
        # M axis span both TensorCores on v7x.
        tm = 128
        b_total = _round_up(batch, tm)
        if b_total != batch:
            x_p = jnp.pad(x2d, ((0, b_total - batch), (0, 0)))
        else:
            x_p = x2d

    grid = (b_total // tm,)

    cost = pl.CostEstimate(
        flops=2 * b_total * in_features * out_pad,
        transcendentals=0,
        bytes_accessed=4 * (b_total * in_features      # x
                            + in_features * out_pad    # weight
                            + out_pad                  # bias
                            + b_total * out_pad),      # out
    )

    out_padded = pl.pallas_call(
        _linear_kernel,
        out_shape=jax.ShapeDtypeStruct((b_total, out_pad), jnp.float32),
        grid_spec=pltpu.PrefetchScalarGridSpec(
            num_scalar_prefetch=0,
            grid=grid,
            in_specs=[
                # x: one M-tile per grid step (last dim = full in_features -> legal)
                pl.BlockSpec((tm, in_features), lambda i: (i, 0)),
                # weight / bias: same block every step -> stays resident in VMEM
                pl.BlockSpec((in_features, out_pad), lambda i: (0, 0)),
                pl.BlockSpec((1, out_pad), lambda i: (0, 0)),
            ],
            out_specs=pl.BlockSpec((tm, out_pad), lambda i: (i, 0)),
        ),
        compiler_params=pltpu.CompilerParams(
            dimension_semantics=("parallel",),
        ),
        cost_estimate=cost,
    )(x_p, w_t_pad, b_pad)

    # Slice the zero-padding back off (exact math: padded lanes/rows are zero
    # or never written back as results).
    return out_padded[:batch, :out_features]


def init_params(key, n_mac, n_job):
    """Deterministic init mimicking nn.Linear default (U[-1/sqrt(fan_in), +])."""
    in_features = n_mac * n_job
    k_w, k_b = jax.random.split(key)
    bound = 1.0 / math.sqrt(in_features)
    weight = jax.random.uniform(
        k_w, (n_mac, in_features), jnp.float32, minval=-bound, maxval=bound
    )
    bias = jax.random.uniform(
        k_b, (n_mac,), jnp.float32, minval=-bound, maxval=bound
    )
    return weight, bias


if __name__ == "__main__":
    n_mac, n_job = 8, 4  # in_features = 32, out_features = 8

    key = jax.random.PRNGKey(0)
    k_x, k_p, k_b, k_c = jax.random.split(key, 4)

    weight, bias = init_params(k_p, n_mac, n_job)
    # Pad/transpose the static params exactly once.
    w_t_pad, b_pad = prepare_params(weight, bias)

    # --- module-semantics path: single 1-D state vector -> (1, n_mac) ---
    x = jax.random.normal(k_x, (n_mac * n_job,), jnp.float32)
    out = dqn_network_forward(x, w_t_pad, b_pad, n_mac)
    out = jax.block_until_ready(out)

    ref = x.reshape(1, -1) @ weight.T + bias.reshape(1, -1)
    assert out.shape == (1, n_mac)
    assert jnp.allclose(out, ref, atol=1e-5, rtol=1e-5)

    # --- batched fast path (single full-dim block, no padding): (B, F) -> (B, n_mac) ---
    B = 16
    xb = jax.random.normal(k_b, (B, n_mac * n_job), jnp.float32)
    out_b = jax.block_until_ready(dqn_network_forward(xb, w_t_pad, b_pad, n_mac))
    ref_b = xb @ weight.T + bias.reshape(1, -1)
    assert out_b.shape == (B, n_mac)
    assert jnp.allclose(out_b, ref_b, atol=1e-5, rtol=1e-5)

    # --- large-batch path (tm=128 tiles + tail padding): exercises the grid ---
    B2 = 132
    xc = jax.random.normal(k_c, (B2, n_mac * n_job), jnp.float32)
    out_c = jax.block_until_ready(dqn_network_forward(xc, w_t_pad, b_pad, n_mac))
    ref_c = xc @ weight.T + bias.reshape(1, -1)
    assert out_c.shape == (B2, n_mac)
    assert jnp.allclose(out_c, ref_c, atol=1e-5, rtol=1e-5)

    print("KERNEL_OK")
</pallas_src>

<mosaic_0001>
module attributes {stable_mosaic.version = 11 : i64} {
  func.func @_linear_kernel(%arg0: i32, %arg1: memref<1x32xf32, #tpu.memory_space<vmem>>, %arg2: memref<32x128xf32, #tpu.memory_space<vmem>>, %arg3: memref<1x128xf32, #tpu.memory_space<vmem>>, %arg4: memref<1x128xf32, #tpu.memory_space<vmem>>) attributes {dimension_semantics = [#tpu.dimension_semantics<parallel>], iteration_bounds = array<i64: 1>, scalar_prefetch = 0 : i64, scratch_operands = 0 : i64, tpu.core_type = #tpu.core_type<tc>, window_params = [{transform_indices = @transform_0, window_bounds = array<i64: 1, 32>}, {pipeline_mode = #tpu.pipeline_mode<synchronous>, transform_indices = @transform_1, window_bounds = array<i64: 32, 128>}, {pipeline_mode = #tpu.pipeline_mode<synchronous>, transform_indices = @transform_2, window_bounds = array<i64: 1, 128>}, {transform_indices = @transform_3, window_bounds = array<i64: 1, 128>}]} {
    %c0 = arith.constant 0 : index
    %c0_0 = arith.constant 0 : index
    %0 = vector.load %arg1[%c0, %c0_0] : memref<1x32xf32, #tpu.memory_space<vmem>>, vector<1x32xf32>
    %c0_1 = arith.constant 0 : index
    %c0_2 = arith.constant 0 : index
    %1 = vector.load %arg2[%c0_1, %c0_2] : memref<32x128xf32, #tpu.memory_space<vmem>>, vector<32x128xf32>
    %cst = arith.constant dense<0.000000e+00> : vector<1x128xf32>
    %2 = tpu.matmul %0, %1, %cst {dimension_numbers = #tpu.dot_dimension_numbers<[1], [0], [0], [1], [0, 0, 1, 1], [], []>} : vector<1x32xf32>, vector<32x128xf32>, vector<1x128xf32> -> vector<1x128xf32>
    %c0_3 = arith.constant 0 : index
    %c0_4 = arith.constant 0 : index
    %3 = vector.load %arg3[%c0_3, %c0_4] : memref<1x128xf32, #tpu.memory_space<vmem>>, vector<1x128xf32>
    %4 = arith.addf %2, %3 : vector<1x128xf32>
    %c0_5 = arith.constant 0 : index
    %c0_6 = arith.constant 0 : index
    %5 = vector.load %arg4[%c0_5, %c0_6] : memref<1x128xf32, #tpu.memory_space<vmem>>, vector<1x128xf32>
    tpu.vector_store %arg4[%c0_5, %c0_6], %4 {strides = array<i32>} : memref<1x128xf32, #tpu.memory_space<vmem>>, vector<1x128xf32>,
    return
  }
  func.func @transform_0(%arg0: i32) -> (i32, i32) {
    %c0_i32 = arith.constant 0 : i32
    %c0_i32_0 = arith.constant 0 : i32
    return %arg0, %c0_i32 : i32, i32
  }
  func.func @transform_1(%arg0: i32) -> (i32, i32) {
    %c0_i32 = arith.constant 0 : i32
    %c0_i32_0 = arith.constant 0 : i32
    %c0_i32_1 = arith.constant 0 : i32
    return %c0_i32, %c0_i32_0 : i32, i32
  }
  func.func @transform_2(%arg0: i32) -> (i32, i32) {
    %c0_i32 = arith.constant 0 : i32
    %c0_i32_0 = arith.constant 0 : i32
    %c0_i32_1 = arith.constant 0 : i32
    return %c0_i32, %c0_i32_0 : i32, i32
  }
  func.func @transform_3(%arg0: i32) -> (i32, i32) {
    %c0_i32 = arith.constant 0 : i32
    %c0_i32_0 = arith.constant 0 : i32
    return %arg0, %c0_i32 : i32, i32
  }
}

</mosaic_0001>

<bundles_post_ra>
// kernel: tpu_custom_call.1
= control target key start
LH: loop header
LB: loop body
LE: loop exit
PB: predicated region body
PF: predicated region fallthrough
CT: control target
= control target key end

     0   :  { %8 = vsyncpa [#allocation3], 0  ;;  %s267_s0 = inlined_call_operand.hbm [shape: f32[1,32], index: 0, kind: input, shape index: {}]   ;;  %s268_s1 = inlined_call_operand.hbm [shape: f32[32,128], index: 1, kind: input, shape index: {}]   ;;  %s269_s2 = inlined_call_operand.vmem [shape: f32[1,128], index: 2, kind: input, shape index: {}]   ;;  %s270_s3 = inlined_call_operand.hbm [shape: f32[1,128], index: 3, kind: output, shape index: {}]  }
   0x1   :  { %9 = vsyncpa [#allocation6], 0 }
   0x2   :  { %10 = vsyncpa [#allocation4], 0  ;;  %s228_s12 = smov [#allocation2]   ;;  %s229_s14 = smov [#allocation5]  }
   0x3   :  { %s17_s13 = sshll.u32 %s228_s12, 4  ;;  %s26_s15 = sshll.u32 %s229_s14, 4  ;;  %s18_s13 = int_to_ptr.vmem [resolvable:$true] %s17_s13  ;;  %s27_s15 = int_to_ptr.vmem [resolvable:$true] %s26_s15 }
   0x4   :  { %s170_s16 = scalar_lea.vmem %s18_s13, 16  ;;  %s174_s17 = scalar_lea.vmem %s18_s13, 32 }
   0x5   :  { %p171_p0 = scmp.ne.s32.totalorder %s18_s13, %s170_s16  ;;  %p175_p1 = scmp.lt.s32.totalorder %s18_s13, %s18_s13 }
   0x6   :  { %p176_p2 = scmp.lt.s32.totalorder %s174_s17, %s170_s16 }
   0x8   :  { %p177_p3 = por %p176_p2, %p175_p1 }
   0xa   :  { %p178_p4 = pnand %p177_p3, %p171_p0 }
   0xc   :  { %181 = shalt.err (!%p178_p4)
}
   0xd   :  { %20 = dma.hbm_to_vmem [thread:$0]  %s267_s0, 16, %s18_s13, [#allocation3]  }
   0xe   :  { %s190_s20 = scalar_lea.vmem %s27_s15, 512  ;;  %p195_p6 = scmp.lt.s32.totalorder %s27_s15, %s27_s15 }
   0xf   :  { %p191_p5 = scmp.ne.s32.totalorder %s27_s15, %s190_s20  ;;  %p196_p7 = scmp.lt.s32.totalorder %s190_s20, %s190_s20 }
  0x11   :  { %p197_p8 = por %p196_p7, %p195_p6 }
  0x13   :  { %p198_p9 = pnand %p197_p8, %p191_p5 }
  0x15   :  { %201 = shalt.err (!%p198_p9)
}
  0x16   :  { %s230_s21 = smov 128   ;;  %s231_s22 = smov 8  }
  0x17   :  { %32 = dma.hbm_to_vmem [thread:$0]  %s268_s1, 512, %s27_s15, [#allocation6], %s230_s21, %s230_s21, %s231_s22  }
  0x18   :  { %222 = dma.done.wait [#allocation3], 16  }
  0x19   :  { %223 = vsyncadd [#allocation3], 4294967280 }
  0x1a   :  { %224 = dma.done.wait [#allocation6], 512  }
  0x1b   :  { %225 = vsyncadd [#allocation6], 4294966784  ;;  %v232_v0 = vmov 0.0   ;;  %vm233_vm0 = vmmov 0   ;;  %v45_v1 = vld [vmem:[#allocation5 + $0x18] sm:$0xff]  ;;  %v44_v2 = vld [vmem:[#allocation5 + $0x10] sm:$0xff] }
  0x1c   :  { %144 = vmatprep.subr.mxu0 %v232_v0  ;;  %152 = vmatprep.mubr.msk.f32.mxu0 %vm233_vm0, %v232_v0  ;;  %v43_v3 = vld [vmem:[#allocation5 + $0x8] sm:$0xff]  ;;  %v42_v4 = vld [vmem:[#allocation5] sm:$0xff]  ;;  %v41_v5 = vld [vmem:[#allocation2] sm:$0x1]  ;;  %vm47_vm1 = vcmask 261120   ;;  %s234_s25 = smov [#allocation7]  }
  0x1d   :  { %145 = vmatpush3.msra.mxu0 %v45_v1  ;;  %v46_v6 = vld [vmem:[%s269_s2] sm:$0x1]  ;;  %s128_s26 = sshll.u32 %s234_s25, 4  ;;  %s129_s26 = int_to_ptr.vmem [resolvable:$true] %s128_s26 }
  0x1e   :  { %146 = vmatprep.subr.mxu0 %v232_v0  ;;  %s202_s27 = scalar_lea.vmem %s129_s26, 16  ;;  %s206_s28 = scalar_lea.vmem %s129_s26, 32 }
  0x1f   :  { %147 = vmatpush3.msra.mxu0 %v44_v2  ;;  %p203_p10 = scmp.ne.s32.totalorder %s129_s26, %s202_s27  ;;  %p207_p11 = scmp.lt.s32.totalorder %s129_s26, %s129_s26 }
  0x20   :  { %148 = vmatprep.subr.mxu0 %v232_v0  ;;  %p208_p12 = scmp.lt.s32.totalorder %s206_s28, %s202_s27 }
  0x21   :  { %149 = vmatpush3.msra.mxu0 %v43_v3 }
  0x22   :  { %150 = vmatprep.subr.mxu0 %v232_v0  ;;  %p209_p13 = por %p208_p12, %p207_p11 }
  0x23   :  { %151 = vmatpush3.msra.mxu0 %v42_v4 }
  0x24   :  { %153 = vmatmul.mubr.msk.f32.vlgmr.msra.gmra.mxu0 %vm47_vm1, %v41_v5  ;;  %p210_p0 = pnand %p209_p13, %p203_p10 }
  0xe4   :  { %v117_v7 = vpop.f32.mrf.mxu0 }
  0xe5   :  { %v118_v8 = vadd.f32 %v117_v7, %v46_v6 }
  0xe6   :  { %v154_v9 = vpop.f32.mrf.mxu0 }
  0xe7   :  { %121 = vst [vmem:[#allocation7] sm:$0x1] %v118_v8 }
  0xe8   :  { %213 = shalt.err (!%p210_p0)
}
  0xe9   :  { %131 = dma.vmem_to_hbm [thread:$0]  %s129_s26, 16, %s270_s3, [#allocation4]  }
  0xea   :  { %226 = dma.done.wait [#allocation4], 16  }
  0xeb   :  { %227 = vsyncadd [#allocation4], 4294967280 }
  0xec   :  { %135 = vsyncpa [#allocation3], 1 }
  0xed   :  { %136 = vsyncpa [#allocation6], 1 }
  0xee   :  { %137 = vsyncpa [#allocation4], 1 }

</bundles_post_ra>
